<compile_context>
chip_gen: v6e
topology: v6e:2x2x1
jax: 0.10.0
libtpu: 0.0.40
codegen_flags: <defaults>
</compile_context>

<pallas_src>
import jax
import jax.numpy as jnp
from jax.experimental import pallas as pl
from jax.experimental.pallas import tpu as pltpu


def mlp_bn_kernel(x_ref, w1_ref, w2_ref, w3_ref, p_ref, o_ref):
    h1 = w1_ref.shape[1]          # H1
    h2 = w2_ref.shape[1]          # H2
    hp = w3_ref.shape[1]          # 128 (lane-padded 64)

    # ---- unpack the small-parameter slab (single DMA, packed at init) ----
    b1 = p_ref[0:1, 0:h1]         # (1, H1)
    b2 = p_ref[1:2, 0:h2]         # (1, H2)
    b3 = p_ref[2:3, 0:hp]         # (1, 128)  zeros beyond 64
    w4c0 = p_ref[3:4, 0:hp]       # (1, 128)  == w4[:, 0], zero-padded
    w4c1 = p_ref[4:5, 0:hp]       # (1, 128)  == w4[:, 1], zero-padded
    gamma = p_ref[5:6, 0:2]       # (1, 2)
    beta = p_ref[6:7, 0:2]        # (1, 2)

    # ---- hidden layer 1: cast x to bf16 in-kernel, MXU matmul, f32 acc ----
    x = x_ref[...].astype(jnp.bfloat16)
    h = jnp.dot(x, w1_ref[...], preferred_element_type=jnp.float32)
    h = jnp.maximum(h + b1, 0.0)
    # ---- hidden layer 2 ----
    h = jnp.dot(h.astype(jnp.bfloat16), w2_ref[...],
                preferred_element_type=jnp.float32)
    h = jnp.maximum(h + b2, 0.0)
    # ---- hidden layer 3: Linear(H2, 64), lane-padded to 128 ----
    h = jnp.dot(h.astype(jnp.bfloat16), w3_ref[...],
                preferred_element_type=jnp.float32)
    h = jnp.maximum(h + b3, 0.0)                      # (B, 128), pad lanes = 0

    # ---- output head Linear(64, 2) on the VPU (avoid tiny MXU push/pop) ----
    z0 = jnp.sum(h * w4c0, axis=-1, keepdims=True)    # (B, 1)
    z1 = jnp.sum(h * w4c1, axis=-1, keepdims=True)    # (B, 1)
    col = jax.lax.broadcasted_iota(jnp.int32, (h.shape[0], 2), 1)
    # b4 intentionally omitted: it cancels exactly under batch-stat BatchNorm.
    z = jnp.where(col == 0, z0, z1)                   # (B, 2)

    # ---- BatchNorm1d(2), training-mode batch statistics ----
    mean = jnp.mean(z, axis=0, keepdims=True)
    z_c = z - mean
    var = jnp.mean(z_c * z_c, axis=0, keepdims=True)  # biased variance
    scale = jax.lax.rsqrt(var + 1e-5) * gamma         # rsqrt -> EUP slot
    o_ref[...] = z_c * scale + beta


def prepare_params(params):
    """One-time parameter packing (hoisted out of the per-call path)."""
    (w1, b1, w2, b2, w3, b3, w4, b4, gamma, beta) = params
    del b4  # dead under batch-stat BatchNorm (cancels in z - mean)
    in_size, h1 = w1.shape
    h2 = w2.shape[1]
    h3 = w3.shape[1]
    hp = max(128, h3)                                  # lane-full width

    w1b = w1.astype(jnp.bfloat16)
    w2b = w2.astype(jnp.bfloat16)
    w3p = (jnp.zeros((h2, hp), jnp.float32).at[:, :h3].set(w3)
           .astype(jnp.bfloat16))

    slab_w = max(128, h1, h2, hp)
    slab = jnp.zeros((8, slab_w), jnp.float32)
    slab = slab.at[0, :h1].set(b1.reshape(-1))
    slab = slab.at[1, :h2].set(b2.reshape(-1))
    slab = slab.at[2, :h3].set(b3.reshape(-1))
    slab = slab.at[3, :h3].set(w4[:, 0])
    slab = slab.at[4, :h3].set(w4[:, 1])
    slab = slab.at[5, :2].set(gamma.reshape(-1))
    slab = slab.at[6, :2].set(beta.reshape(-1))
    return (w1b, w2b, w3p, slab)


@jax.jit
def regression_jkr_norm(x, prepared):
    """x: (B, H, W) float32.  prepared: output of prepare_params.  -> (B, 2)."""
    w1b, w2b, w3p, slab = prepared
    B = x.shape[0]
    in_size, h1 = w1b.shape
    h2, hp = w3p.shape[0], w3p.shape[1]

    x2d = x.reshape(B, -1)            # nn.Flatten(); contiguous reshape = bitcast

    flops = 2 * B * (in_size * h1 + h1 * h2 + h2 * hp + hp * 2)
    bytes_accessed = (x2d.size * 4 + w1b.size * 2 + w2b.size * 2
                      + w3p.size * 2 + slab.size * 4 + B * 2 * 4)

    vmem = pl.BlockSpec(memory_space=pltpu.MemorySpace.VMEM)
    return pl.pallas_call(
        mlp_bn_kernel,
        out_shape=jax.ShapeDtypeStruct((B, 2), jnp.float32),
        in_specs=[vmem] * 5,
        out_specs=vmem,
        cost_estimate=pl.CostEstimate(flops=flops, transcendentals=2,
                                      bytes_accessed=bytes_accessed),
    )(x2d, w1b, w2b, w3p, slab)


def init_params(key, input_size, h1, h2):
    """Deterministic parameter init; weights stored as (in, out)."""
    ks = jax.random.split(key, 8)

    def linear(kw, kb, fan_in, fan_out):
        bound = 1.0 / jnp.sqrt(fan_in)
        w = jax.random.uniform(kw, (fan_in, fan_out), jnp.float32, -bound, bound)
        b = jax.random.uniform(kb, (1, fan_out), jnp.float32, -bound, bound)
        return w, b

    w1, b1 = linear(ks[0], ks[1], input_size, h1)
    w2, b2 = linear(ks[2], ks[3], h1, h2)
    w3, b3 = linear(ks[4], ks[5], h2, 64)
    w4, b4 = linear(ks[6], ks[7], 64, 2)
    gamma = jnp.ones((1, 2), jnp.float32)   # BatchNorm1d default weight
    beta = jnp.zeros((1, 2), jnp.float32)   # BatchNorm1d default bias
    return (w1, b1, w2, b2, w3, b3, w4, b4, gamma, beta)


if __name__ == "__main__":
    # input_shape=(16,16) -> input_size=256, H1=128, H2=128, B=8
    B, H, W = 8, 16, 16
    HIDDEN_UNITS_1_JKR, HIDDEN_UNITS_2_JKR = 128, 128

    key = jax.random.PRNGKey(0)
    kx, kp = jax.random.split(key)
    x = jax.random.normal(kx, (B, H, W), jnp.float32)
    params = init_params(kp, H * W, HIDDEN_UNITS_1_JKR, HIDDEN_UNITS_2_JKR)

    prepared = jax.block_until_ready(prepare_params(params))  # one-time packing

    out = regression_jkr_norm(x, prepared)
    jax.block_until_ready(out)

    # Plain-JAX reference using the same bf16-operand / f32-accumulate matmul
    # scheme; includes b4 to verify it cancels under batch-stat BatchNorm.
    w1, b1, w2, b2, w3, b3, w4, b4, gamma, beta = params
    xb = x.reshape(B, -1).astype(jnp.bfloat16)
    h = jnp.maximum(jnp.dot(xb, w1.astype(jnp.bfloat16),
                            preferred_element_type=jnp.float32) + b1, 0.0)
    h = jnp.maximum(jnp.dot(h.astype(jnp.bfloat16), w2.astype(jnp.bfloat16),
                            preferred_element_type=jnp.float32) + b2, 0.0)
    h = jnp.maximum(jnp.dot(h.astype(jnp.bfloat16), w3.astype(jnp.bfloat16),
                            preferred_element_type=jnp.float32) + b3, 0.0)
    z = h @ w4 + b4
    mu = z.mean(0, keepdims=True)
    var = ((z - mu) ** 2).mean(0, keepdims=True)
    ref = (z - mu) / jnp.sqrt(var + 1e-5) * gamma + beta

    assert out.shape == (B, 2)
    assert jnp.allclose(out, ref, atol=1e-2, rtol=1e-2)
    print("KERNEL_OK")
</pallas_src>

<mosaic_0001>
module attributes {stable_mosaic.version = 11 : i64} {
  func.func @mlp_bn_kernel(%arg0: memref<8x256xf32, #tpu.memory_space<vmem>>, %arg1: memref<256x128xbf16, #tpu.memory_space<vmem>>, %arg2: memref<128x128xbf16, #tpu.memory_space<vmem>>, %arg3: memref<128x128xbf16, #tpu.memory_space<vmem>>, %arg4: memref<8x128xf32, #tpu.memory_space<vmem>>, %arg5: memref<8x2xf32, #tpu.memory_space<vmem>>) attributes {dimension_semantics = [], scalar_prefetch = 0 : i64, scratch_operands = 0 : i64, tpu.core_type = #tpu.core_type<tc>} {
    %c0 = arith.constant 0 : index
    %c0_0 = arith.constant 0 : index
    %0 = vector.load %arg4[%c0, %c0_0] : memref<8x128xf32, #tpu.memory_space<vmem>>, vector<1x128xf32>
    %c1 = arith.constant 1 : index
    %c0_1 = arith.constant 0 : index
    %1 = vector.load %arg4[%c1, %c0_1] : memref<8x128xf32, #tpu.memory_space<vmem>>, vector<1x128xf32>
    %c2 = arith.constant 2 : index
    %c0_2 = arith.constant 0 : index
    %2 = vector.load %arg4[%c2, %c0_2] : memref<8x128xf32, #tpu.memory_space<vmem>>, vector<1x128xf32>
    %c3 = arith.constant 3 : index
    %c0_3 = arith.constant 0 : index
    %3 = vector.load %arg4[%c3, %c0_3] : memref<8x128xf32, #tpu.memory_space<vmem>>, vector<1x128xf32>
    %c4 = arith.constant 4 : index
    %c0_4 = arith.constant 0 : index
    %4 = vector.load %arg4[%c4, %c0_4] : memref<8x128xf32, #tpu.memory_space<vmem>>, vector<1x128xf32>
    %c5 = arith.constant 5 : index
    %c0_5 = arith.constant 0 : index
    %5 = vector.load %arg4[%c5, %c0_5] : memref<8x128xf32, #tpu.memory_space<vmem>>, vector<1x2xf32>
    %c6 = arith.constant 6 : index
    %c0_6 = arith.constant 0 : index
    %6 = vector.load %arg4[%c6, %c0_6] : memref<8x128xf32, #tpu.memory_space<vmem>>, vector<1x2xf32>
    %c0_7 = arith.constant 0 : index
    %c0_8 = arith.constant 0 : index
    %7 = vector.load %arg0[%c0_7, %c0_8] : memref<8x256xf32, #tpu.memory_space<vmem>>, vector<8x256xf32>
    %8 = arith.truncf %7 : vector<8x256xf32> to vector<8x256xbf16>
    %c0_9 = arith.constant 0 : index
    %c0_10 = arith.constant 0 : index
    %9 = vector.load %arg1[%c0_9, %c0_10] : memref<256x128xbf16, #tpu.memory_space<vmem>>, vector<256x128xbf16>
    %cst = arith.constant dense<0.000000e+00> : vector<8x128xf32>
    %10 = tpu.matmul %8, %9, %cst {dimension_numbers = #tpu.dot_dimension_numbers<[1], [0], [0], [1], [0, 0, 1, 1], [], []>} : vector<8x256xbf16>, vector<256x128xbf16>, vector<8x128xf32> -> vector<8x128xf32>
    %11 = vector.broadcast %0 : vector<1x128xf32> to vector<8x128xf32>
    %12 = arith.addf %10, %11 : vector<8x128xf32>
    %cst_11 = arith.constant 0.000000e+00 : f32
    %13 = vector.broadcast %cst_11 : f32 to vector<8x128xf32>
    %14 = arith.maximumf %12, %13 : vector<8x128xf32>
    %15 = arith.truncf %14 : vector<8x128xf32> to vector<8x128xbf16>
    %c0_12 = arith.constant 0 : index
    %c0_13 = arith.constant 0 : index
    %16 = vector.load %arg2[%c0_12, %c0_13] : memref<128x128xbf16, #tpu.memory_space<vmem>>, vector<128x128xbf16>
    %cst_14 = arith.constant dense<0.000000e+00> : vector<8x128xf32>
    %17 = tpu.matmul %15, %16, %cst_14 {dimension_numbers = #tpu.dot_dimension_numbers<[1], [0], [0], [1], [0, 0, 1, 1], [], []>} : vector<8x128xbf16>, vector<128x128xbf16>, vector<8x128xf32> -> vector<8x128xf32>
    %18 = vector.broadcast %1 : vector<1x128xf32> to vector<8x128xf32>
    %19 = arith.addf %17, %18 : vector<8x128xf32>
    %cst_15 = arith.constant 0.000000e+00 : f32
    %20 = vector.broadcast %cst_15 : f32 to vector<8x128xf32>
    %21 = arith.maximumf %19, %20 : vector<8x128xf32>
    %22 = arith.truncf %21 : vector<8x128xf32> to vector<8x128xbf16>
    %c0_16 = arith.constant 0 : index
    %c0_17 = arith.constant 0 : index
    %23 = vector.load %arg3[%c0_16, %c0_17] : memref<128x128xbf16, #tpu.memory_space<vmem>>, vector<128x128xbf16>
    %cst_18 = arith.constant dense<0.000000e+00> : vector<8x128xf32>
    %24 = tpu.matmul %22, %23, %cst_18 {dimension_numbers = #tpu.dot_dimension_numbers<[1], [0], [0], [1], [0, 0, 1, 1], [], []>} : vector<8x128xbf16>, vector<128x128xbf16>, vector<8x128xf32> -> vector<8x128xf32>
    %25 = vector.broadcast %2 : vector<1x128xf32> to vector<8x128xf32>
    %26 = arith.addf %24, %25 : vector<8x128xf32>
    %cst_19 = arith.constant 0.000000e+00 : f32
    %27 = vector.broadcast %cst_19 : f32 to vector<8x128xf32>
    %28 = arith.maximumf %26, %27 : vector<8x128xf32>
    %29 = vector.broadcast %3 : vector<1x128xf32> to vector<8x128xf32>
    %30 = arith.mulf %28, %29 : vector<8x128xf32>
    %cst_20 = arith.constant dense<0.000000e+00> : vector<8xf32>
    %31 = vector.multi_reduction <add>, %30, %cst_20 [1] : vector<8x128xf32> to vector<8xf32>
    %32 = vector.shape_cast %31 : vector<8xf32> to vector<8x1xf32>
    %33 = vector.broadcast %4 : vector<1x128xf32> to vector<8x128xf32>
    %34 = arith.mulf %28, %33 : vector<8x128xf32>
    %cst_21 = arith.constant dense<0.000000e+00> : vector<8xf32>
    %35 = vector.multi_reduction <add>, %34, %cst_21 [1] : vector<8x128xf32> to vector<8xf32>
    %36 = vector.shape_cast %35 : vector<8xf32> to vector<8x1xf32>
    %37 = tpu.iota {dimensions = array<i32: 1>} : vector<8x2xi32>
    %c0_i32 = arith.constant 0 : i32
    %38 = vector.broadcast %c0_i32 : i32 to vector<8x2xi32>
    %39 = arith.cmpi eq, %37, %38 : vector<8x2xi32>
    %40 = vector.shape_cast %32 : vector<8x1xf32> to vector<8x1xf32>
    %41 = vector.broadcast %40 : vector<8x1xf32> to vector<8x2xf32>
    %42 = vector.shape_cast %36 : vector<8x1xf32> to vector<8x1xf32>
    %43 = vector.broadcast %42 : vector<8x1xf32> to vector<8x2xf32>
    %44 = arith.select %39, %41, %43 : vector<8x2xi1>, vector<8x2xf32>
    %cst_22 = arith.constant dense<0.000000e+00> : vector<2xf32>
    %45 = vector.multi_reduction <add>, %44, %cst_22 [0] : vector<8x2xf32> to vector<2xf32>
    %46 = vector.shape_cast %45 : vector<2xf32> to vector<1x2xf32>
    %cst_23 = arith.constant 8.000000e+00 : f32
    %47 = vector.broadcast %cst_23 : f32 to vector<1x2xf32>
    %48 = arith.divf %46, %47 : vector<1x2xf32>
    %49 = vector.broadcast %48 : vector<1x2xf32> to vector<8x2xf32>
    %50 = arith.subf %44, %49 : vector<8x2xf32>
    %51 = arith.mulf %50, %50 : vector<8x2xf32>
    %cst_24 = arith.constant dense<0.000000e+00> : vector<2xf32>
    %52 = vector.multi_reduction <add>, %51, %cst_24 [0] : vector<8x2xf32> to vector<2xf32>
    %53 = vector.shape_cast %52 : vector<2xf32> to vector<1x2xf32>
    %cst_25 = arith.constant 8.000000e+00 : f32
    %54 = vector.broadcast %cst_25 : f32 to vector<1x2xf32>
    %55 = arith.divf %53, %54 : vector<1x2xf32>
    %cst_26 = arith.constant 9.99999974E-6 : f32
    %56 = vector.broadcast %cst_26 : f32 to vector<1x2xf32>
    %57 = arith.addf %55, %56 : vector<1x2xf32>
    %58 = math.rsqrt %57 : vector<1x2xf32>
    %59 = arith.mulf %58, %5 : vector<1x2xf32>
    %60 = vector.broadcast %59 : vector<1x2xf32> to vector<8x2xf32>
    %61 = arith.mulf %50, %60 : vector<8x2xf32>
    %62 = vector.broadcast %6 : vector<1x2xf32> to vector<8x2xf32>
    %63 = arith.addf %61, %62 : vector<8x2xf32>
    %c0_27 = arith.constant 0 : index
    %c0_28 = arith.constant 0 : index
    %64 = vector.load %arg5[%c0_27, %c0_28] : memref<8x2xf32, #tpu.memory_space<vmem>>, vector<8x2xf32>
    tpu.vector_store %arg5[%c0_27, %c0_28], %63 {strides = array<i32>} : memref<8x2xf32, #tpu.memory_space<vmem>>, vector<8x2xf32>,
    return
  }
}

</mosaic_0001>

<bundles_post_ra>
// kernel: regression_jkr_norm.1
= control target key start
LH: loop header
LB: loop body
LE: loop exit
PB: predicated region body
PF: predicated region fallthrough
CT: control target
= control target key end

     0   :  { %10 = vsyncpa [#allocation3], 0  ;;  %s854_s0 = inlined_call_operand.vmem [shape: f32[8,256], index: 0, kind: input, shape index: {}]   ;;  %s855_s1 = inlined_call_operand.vmem [shape: bf16[256,128], index: 1, kind: input, shape index: {}]   ;;  %s856_s2 = inlined_call_operand.hbm [shape: bf16[128,128], index: 2, kind: input, shape index: {}]   ;;  %s857_s3 = inlined_call_operand.hbm [shape: bf16[128,128], index: 3, kind: input, shape index: {}]   ;;  %s858_s4 = inlined_call_operand.vmem [shape: f32[8,128], index: 4, kind: input, shape index: {}]   ;;  %s859_s5 = inlined_call_operand.vmem [shape: f32[8,2], index: 5, kind: output, shape index: {}]  }
   0x1   :  { %11 = vsyncpa [#allocation5], 0  ;;  %s713_s18 = smov [#allocation2]  }
   0x2   :  { %s21_s19 = sshll.u32 %s713_s18, 4  ;;  %s22_s19 = int_to_ptr.vmem [resolvable:$true] %s21_s19 }
   0x3   :  { %s677_s20 = scalar_lea.vmem %s22_s19, 1024  ;;  %p682_p1 = scmp.lt.s32.totalorder %s22_s19, %s22_s19 }
   0x4   :  { %p678_p0 = scmp.ne.s32.totalorder %s22_s19, %s677_s20  ;;  %p683_p2 = scmp.lt.s32.totalorder %s677_s20, %s677_s20 }
   0x6   :  { %p684_p3 = por %p683_p2, %p682_p1 }
   0x8   :  { %p685_p4 = pnand %p684_p3, %p678_p0 }
   0xa   :  { %688 = shalt.err (!%p685_p4)
}
   0xb   :  { %s714_s21 = smov 64   ;;  %s715_s22 = smov 4  }
   0xc   :  { %27 = dma.hbm_to_vmem [thread:$0]  %s856_s2, 1024, %s22_s19, [#allocation3], %s714_s21, %s714_s21, %s715_s22  }
   0xd   :  { %s716_s25 = smov [#allocation4]  }
   0xe   :  { %s33_s26 = sshll.u32 %s716_s25, 4  ;;  %s34_s26 = int_to_ptr.vmem [resolvable:$true] %s33_s26 }
   0xf   :  { %s697_s27 = scalar_lea.vmem %s34_s26, 1024  ;;  %p702_p6 = scmp.lt.s32.totalorder %s34_s26, %s34_s26 }
  0x10   :  { %p698_p5 = scmp.ne.s32.totalorder %s34_s26, %s697_s27  ;;  %p703_p7 = scmp.lt.s32.totalorder %s697_s27, %s697_s27 }
  0x12   :  { %p704_p8 = por %p703_p7, %p702_p6 }
  0x14   :  { %p705_p9 = pnand %p704_p8, %p698_p5 }
  0x16   :  { %708 = shalt.err (!%p705_p9)
}
  0x17   :  { %39 = dma.hbm_to_vmem [thread:$0]  %s857_s3, 1024, %s34_s26, [#allocation5], %s714_s21, %s714_s21, %s715_s22  }
  0x18   :  { %709 = dma.done.wait [#allocation3], 1024  }
  0x19   :  { %710 = vsyncadd [#allocation3], 4294966272 }
  0x1a   :  { %711 = dma.done.wait [#allocation5], 1024  }
  0x1b   :  { %712 = vsyncadd [#allocation5], 4294966272  ;;  %v717_v0 = vmov 0.0   ;;  %v635_v1 = vld [vmem:[%s855_s1 + $0x78] sm:$0xff]   ;;  %v637_v3 = vld [vmem:[%s855_s1 + $0x70] sm:$0xff]   ;;  %vm718_vm0 = vmmov 0  }
  0x1c   :  { %589 = vmatprep.subr.bf16.mxu1 %v717_v0  ;;  %v636_v2 = vld [vmem:[%s855_s1 + $0x38] sm:$0xff]   ;;  %549 = vmatprep.subr.bf16.mxu0 %v635_v1  ;;  %v638_v4 = vld [vmem:[%s855_s1 + $0x30] sm:$0xff]   ;;  %v639_v5 = vld [vmem:[%s855_s1 + $0x68] sm:$0xff]   ;;  %v467_v1 = vlaneseq  ;;  %vm471_vm2 = vcmask 15360  }
  0x1d   :  { %550 = vmatpush3.bf16.msra.mxu0 %v636_v2  ;;  %v640_v6 = vld [vmem:[%s855_s1 + $0x28] sm:$0xff]   ;;  %v641_v7 = vld [vmem:[%s855_s1 + $0x60] sm:$0xff]   ;;  %v643_v9 = vld [vmem:[%s855_s1 + $0x58] sm:$0xff]   ;;  %605 = vmatprep.mubr.msk.bf16.mxu1 %vm718_vm0, %v717_v0 }
  0x1e   :  { %551 = vmatprep.subr.bf16.mxu0 %v637_v3  ;;  %v642_v8 = vld [vmem:[%s855_s1 + $0x20] sm:$0xff]   ;;  %v644_v10 = vld [vmem:[%s855_s1 + $0x18] sm:$0xff]   ;;  %v645_v11 = vld [vmem:[%s855_s1 + $0x50] sm:$0xff]   ;;  %v468_v2 = vand.u32 127, %v467_v1 }
  0x1f   :  { %v57_v12 = vld [vmem:[%s854_s0 + $0x8] sm:$0xff]  ;;  %v651_v14 = vld [vmem:[#allocation2 + $0x38] sm:$0xff]   ;;  %v646_v15 = vld [vmem:[%s855_s1 + $0x10] sm:$0xff]  }
  0x20   :  { %v59_v13 = vpack.c.bf16 %v57_v12, %v57_v12  ;;  %v647_v16 = vld [vmem:[%s855_s1 + $0x48] sm:$0xff]   ;;  %590 = vmatpush3.bf16.msra.mxu1 %v651_v14  ;;  %v652_v17 = vld [vmem:[#allocation2 + $0x30] sm:$0xff]   ;;  %v649_v19 = vld [vmem:[%s855_s1 + $0x40] sm:$0xff]   ;;  %vm469_vm1 = vcmp.eq.s32.totalorder %v468_v2, 0 }
  0x21   :  { %552 = vmatpush3.bf16.msra.mxu0 %v638_v4  ;;  %v648_v18 = vld [vmem:[%s855_s1 + $0x8] sm:$0xff]   ;;  %591 = vmatprep.subr.bf16.mxu1 %v717_v0  ;;  %v650_v21 = vld [vmem:[%s855_s1] sm:$0xff]   ;;  %v655_v25 = vld [vmem:[#allocation2 + $0x18] sm:$0xff]  }
  0x22   :  { %553 = vmatprep.subr.bf16.mxu0 %v639_v5  ;;  %224 = vmatprep.mubr.bf16.mxu0 %v59_v13  ;;  %v653_v20 = vld [vmem:[#allocation2 + $0x28] sm:$0xff]   ;;  %v56_v22 = vld [vmem:[%s854_s0] sm:$0xff]  ;;  %v656_v26 = vld [vmem:[#allocation2 + $0x10] sm:$0xff]  }
  0x23   :  { %v654_v23 = vld [vmem:[#allocation2 + $0x20] sm:$0xff]   ;;  %v58_v24 = vpack.c.bf16 %v56_v22, %v56_v22  ;;  %v657_v27 = vld [vmem:[#allocation2 + $0x8] sm:$0xff]   ;;  %v659_v29 = vld [vmem:[#allocation4 + $0x38] sm:$0xff]  }
  0x24   :  { %592 = vmatpush3.bf16.msra.mxu1 %v652_v17  ;;  %v658_v28 = vld [vmem:[#allocation2] sm:$0xff]   ;;  %v660_v30 = vld [vmem:[#allocation4 + $0x30] sm:$0xff]   ;;  %v661_v31 = vld [vmem:[#allocation4 + $0x28] sm:$0xff]  }
  0x25   :  { %554 = vmatpush3.bf16.msra.mxu0 %v640_v6  ;;  %593 = vmatprep.subr.bf16.mxu1 %v717_v0  ;;  %v662_v32 = vld [vmem:[#allocation4 + $0x20] sm:$0xff]   ;;  %v663_v33 = vld [vmem:[#allocation4 + $0x18] sm:$0xff]   ;;  %v664_v34 = vld [vmem:[#allocation4 + $0x10] sm:$0xff]  }
  0x26   :  { %555 = vmatprep.subr.bf16.mxu0 %v641_v7  ;;  %v511_v36 = vld [vmem:[%s858_s4] ss:$0 sm:$0xff]  ;;  %v665_v44 = vld [vmem:[#allocation4 + $0x8] sm:$0xff]   ;;  %v528_v46 = vld [vmem:[%s858_s4 + $0x1] ss:$0 sm:$0xff] }
  0x27   :  { %v666_v45 = vld [vmem:[#allocation4] sm:$0xff]  }
  0x28   :  { %594 = vmatpush3.bf16.msra.mxu1 %v653_v20  ;;  %v537_v54 = vld [vmem:[%s858_s4 + $0x2] ss:$0 sm:$0xff]  ;;  %v546_v58 = vld [vmem:[%s858_s4 + $0x3] ss:$0 sm:$0xff]  ;;  %v547_v63 = vld [vmem:[%s858_s4 + $0x4] ss:$0 sm:$0xff] }
  0x29   :  { %556 = vmatpush3.bf16.msra.mxu0 %v642_v8  ;;  %595 = vmatprep.subr.bf16.mxu1 %v717_v0 }
  0x2a   :  { %557 = vmatprep.subr.bf16.mxu0 %v643_v9 }
  0x2c   :  { %596 = vmatpush3.bf16.msra.mxu1 %v654_v23 }
  0x2d   :  { %558 = vmatpush3.bf16.msra.mxu0 %v644_v10  ;;  %597 = vmatprep.subr.bf16.mxu1 %v717_v0 }
  0x2e   :  { %559 = vmatprep.subr.bf16.mxu0 %v645_v11 }
  0x30   :  { %598 = vmatpush3.bf16.msra.mxu1 %v655_v25  ;;  %v495_v25 = vshrl.u32 %v467_v1, 7 }
  0x31   :  { %560 = vmatpush3.bf16.msra.mxu0 %v646_v15  ;;  %599 = vmatprep.subr.bf16.mxu1 %v717_v0 }
  0x32   :  { %561 = vmatprep.subr.bf16.mxu0 %v647_v16 }
  0x34   :  { %600 = vmatpush3.bf16.msra.mxu1 %v656_v26  ;;  %v54_v26 = vld [vmem:[%s858_s4 + $0x5] sm:$0x1] }
  0x35   :  { %562 = vmatpush3.bf16.msra.mxu0 %v648_v18  ;;  %601 = vmatprep.subr.bf16.mxu1 %v717_v0 }
  0x36   :  { %563 = vmatprep.subr.bf16.mxu0 %v649_v19 }
  0x38   :  { %602 = vmatpush3.bf16.msra.mxu1 %v657_v27  ;;  %v496_v27 = vsub.s32 0, %v495_v25 }
  0x39   :  { %564 = vmatpush3.bf16.msra.mxu0 %v650_v21  ;;  %603 = vmatprep.subr.bf16.mxu1 %v717_v0 }
  0x3a   :  { %609 = vmatprep.subr.bf16.mxu0 %v717_v0 }
  0x3c   :  { %225 = vmatmul.mubr.bf16.vlgmr.msra.gmra.mxu0 %v58_v24  ;;  %604 = vmatpush3.bf16.msra.mxu1 %v658_v28 }
  0x3d   :  { %625 = vmatprep.mubr.msk.bf16.mxu0 %vm718_vm0, %v717_v0  ;;  %610 = vmatpush3.bf16.msra.mxu0 %v659_v29 }
  0x3e   :  { %611 = vmatprep.subr.bf16.mxu0 %v717_v0 }
  0x41   :  { %612 = vmatpush3.bf16.msra.mxu0 %v660_v30 }
  0x42   :  { %613 = vmatprep.subr.bf16.mxu0 %v717_v0 }
  0x45   :  { %614 = vmatpush3.bf16.msra.mxu0 %v661_v31  ;;  %v548_v31 = vld [vmem:[%s858_s4 + $0x6] ss:$0 sm:$0xff] }
  0x46   :  { %615 = vmatprep.subr.bf16.mxu0 %v717_v0 }
  0x49   :  { %616 = vmatpush3.bf16.msra.mxu0 %v662_v32 }
  0x4a   :  { %617 = vmatprep.subr.bf16.mxu0 %v717_v0 }
  0x4d   :  { %618 = vmatpush3.bf16.msra.mxu0 %v663_v33 }
  0x4e   :  { %619 = vmatprep.subr.bf16.mxu0 %v717_v0 }
  0x51   :  { %620 = vmatpush3.bf16.msra.mxu0 %v664_v34 }
  0x52   :  { %621 = vmatprep.subr.bf16.mxu0 %v717_v0 }
  0x55   :  { %622 = vmatpush3.bf16.msra.mxu0 %v665_v44 }
  0x56   :  { %623 = vmatprep.subr.bf16.mxu0 %v717_v0 }
  0x59   :  { %624 = vmatpush3.bf16.msra.mxu0 %v666_v45 }
  0xfc   :  { %v565_v35 = vpop.f32.mrf.mxu0 }
  0xfe   :  { %v566_v37 = vpop.f32.mrf.mxu0 }
  0xff   :  { %v567_v38 = vadd.f32 %v566_v37, %v565_v35 }
 0x100   :  { %v568_v39 = vpop.f32.mrf.mxu0 }
 0x101   :  { %v227_v40 = vadd.f32 %v567_v38, %v511_v36 }
 0x102   :  { %v569_v41 = vpop.f32.mrf.mxu0 }
 0x103   :  { %v232_v42 = vmax.f32 %v227_v40, 0.0 }
 0x105   :  { %v233_v43 = vpack.c.bf16 %v232_v42, %v232_v42 }
 0x107   :  { %606 = vmatmul.mubr.bf16.vlgmr.msra.gmra.mxu1 %v233_v43 }
 0x1c7   :  { %v336_v47 = vpop.f32.mrf.mxu1 }
 0x1c8   :  { %v337_v48 = vadd.f32 %v528_v46, %v336_v47 }
 0x1c9   :  { %v607_v49 = vpop.f32.mrf.mxu1 }
 0x1ca   :  { %v342_v50 = vmax.f32 %v337_v48, 0.0 }
 0x1cb   :  { %v339_v51 = vpop.f32.mrf.mxu1 }
 0x1cc   :  { %v343_v52 = vpack.c.bf16 %v342_v50, %v342_v50 }
 0x1cd   :  { %v608_v53 = vpop.f32.mrf.mxu1 }
 0x1ce   :  { %626 = vmatmul.mubr.bf16.vlgmr.msra.gmra.mxu0 %v343_v52 }
 0x28e   :  { %v446_v55 = vpop.f32.mrf.mxu0 }
 0x28f   :  { %v447_v56 = vadd.f32 %v537_v54, %v446_v55 }
 0x290   :  { %v627_v57 = vpop.f32.mrf.mxu0 }
 0x291   :  { %v452_v59 = vmax.f32 %v447_v56, 0.0 }
 0x292   :  { %v449_v60 = vpop.f32.mrf.mxu0 }
 0x293   :  { %v457_v61 = vmul.f32 %v546_v58, %v452_v59  ;;  %v464_v0 = vmul.f32 %v547_v63, %v452_v59 }
 0x294   :  { %v628_v62 = vpop.f32.mrf.mxu0 }
 0x295   :  { %458 = vadd.xlane.f32.xlu0 %v457_v61 }
 0x299   :  { %465 = vadd.xlane.f32.xlu0 %v464_v0 }
 0x31e   :  { %v459_v3 = vpop.xlane.xlu0 %458 }
 0x322   :  { %v466_v4 = vpop.xlane.xlu0 %465 }
 0x323   :  { %v470_v5 = vsel %vm469_vm1, %v459_v3, %v466_v4 }
 0x324   :  { %v472_v6 = vsel %vm471_vm2, %v470_v5, 0.0 }
 0x325   :  { %v473_v7 = vrot.slane %v472_v6, 4 }
 0x327   :  { %v474_v8 = vadd.f32 %v473_v7, %v472_v6 }
 0x329   :  { %v475_v9 = vrot.slane %v474_v8, 2 }
 0x32b   :  { %v476_v10 = vadd.f32 %v475_v9, %v474_v8 }
 0x32d   :  { %v477_v11 = vrot.slane %v476_v10, 1 }
 0x32f   :  { %v478_v12 = vadd.f32 %v477_v11, %v476_v10 }
 0x331   :  { %v480_v13 = vmul.f32 0.125, %v478_v12 }
 0x333   :  { %v481_v14 = vsub.f32 %v470_v5, %v480_v13 }
 0x335   :  { %v482_v15 = vmul.f32 %v481_v14, %v481_v14 }
 0x337   :  { %v483_v16 = vsel %vm471_vm2, %v482_v15, 0.0 }
 0x338   :  { %v484_v17 = vrot.slane %v483_v16, 4 }
 0x33a   :  { %v485_v18 = vadd.f32 %v484_v17, %v483_v16 }
 0x33c   :  { %v486_v19 = vrot.slane %v485_v18, 2 }
 0x33e   :  { %v487_v20 = vadd.f32 %v486_v19, %v485_v18 }
 0x340   :  { %v488_v21 = vrot.slane %v487_v20, 1 }
 0x342   :  { %v489_v22 = vadd.f32 %v488_v21, %v487_v20 }
 0x344   :  { %v490_v23 = vmul.f32 0.125, %v489_v22 }
 0x346   :  { %v491_v24 = vadd.f32 1e-05, %v490_v23 }
 0x348   :  { %667 = vrsqrt.f32 %v491_v24 }
 0x355   :  { %v668_v28 = vpop.eup %667 }
 0x356   :  { %v493_v29 = vmul.f32 %v668_v28, %v54_v26 }
 0x358   :  { %v497_v30 = vrot.slane %v493_v29, %v496_v27 }
 0x35a   :  { %v498_v32 = vmul.f32 %v497_v30, %v481_v14 }
 0x35c   :  { %v503_v33 = vadd.f32 %v548_v31, %v498_v32 }
 0x35e   :  { %504 = vst.msk [vmem:[%s859_s5] sm:$0xff] %vm471_vm2, %v503_v33 }
 0x35f   :  { %509 = vsyncpa [#allocation3], 1 }
 0x360   :  { %510 = vsyncpa [#allocation5], 1 }

</bundles_post_ra>
